<compile_context>
chip_gen: v7x
topology: tpu7x:2x2x1
jax: 0.10.0
libtpu: 0.0.40
codegen_flags: <defaults>
</compile_context>

<pallas_src>
import functools

import jax
import jax.numpy as jnp
from jax.experimental import pallas as pl
from jax.experimental.pallas import tpu as pltpu


_VMEM_LIMIT = 48 * 1024 * 1024      # safe on v7x (64 MiB VMEM), ample for v5e/v6e tiles


def _round_down(x, m):
    return (x // m) * m


# ---------------------------------------------------------------------------
# STREAM path
# ---------------------------------------------------------------------------
def _stream_kernel(logits_ref, labels_ref, out_ref, acc_ref, *, tile_b, tile_c):
    ci = pl.program_id(1)                       # class-block index (reduction axis)

    @pl.when(ci == 0)
    def _init():
        acc_ref[...] = jnp.zeros_like(acc_ref)

    # One-hot mask from a single (1, tc) iota vs. class-block-relative labels.
    # (labels were padded host-side with -1, so no row-validity mask is needed;
    #  padded / ragged logits garbage can never be selected.)
    labels_rel = labels_ref[...] - ci * tile_c                        # (tb, 1) i32
    col_ids = jax.lax.broadcasted_iota(jnp.int32, (1, tile_c), 1)     # (1, tc) i32
    mask = col_ids == labels_rel                                      # (tb, tc) bool

    # Select in the native dtype, accumulate in f32 (where, not multiply, so any
    # NaN/Inf in block padding is discarded).
    sel = jnp.where(mask, logits_ref[...], 0).astype(jnp.float32)     # (tb, tc) f32

    # Reduce (tb, tc) -> one (8, 128) vreg using only (8,128)-aligned static
    # slices: pure VALU adds, no relayout, no per-step XLU full reduction.
    part = sel[:, 0:128]
    for j in range(1, tile_c // 128):
        part = part + sel[:, j * 128:(j + 1) * 128]                   # (tb, 128)
    vreg = part[0:8, :]
    for i in range(1, tile_b // 8):
        vreg = vreg + part[i * 8:(i + 1) * 8, :]                      # (8, 128)
    acc_ref[...] += vreg

    @pl.when(ci == pl.num_programs(1) - 1)
    def _finalize():
        out_ref[...] = acc_ref[...]          # lane-dense per-row-block partial


def _stream_selected_sum(logits, labels, num_rows, row_block, col_block):
    Bp, Cp = logits.shape
    itemsize = jnp.dtype(logits.dtype).itemsize

    # Default tiles: multiples of (8, 128), <= array dims, ~16 MiB double-buffered.
    tb = _round_down(min(512, Bp), 8)
    tc_cap = 4096 if itemsize >= 4 else 8192
    tc = _round_down(min(tc_cap, Cp), 128)
    if row_block is not None:
        tb = max(8, min(_round_down(row_block, 8), _round_down(Bp, 8)))
    if col_block is not None:
        tc = max(128, min(_round_down(col_block, 128), _round_down(Cp, 128)))

    nrb = pl.cdiv(Bp, tb)
    ncb = pl.cdiv(Cp, tc)

    # Pad labels host-side with -1 (impossible class) to a multiple of the row
    # tile so ragged / padded logits rows contribute exactly zero.
    labels_pad = jnp.full((nrb * tb, 1), -1, dtype=jnp.int32)
    labels_pad = labels_pad.at[:num_rows, 0].set(labels)

    partials = pl.pallas_call(
        functools.partial(_stream_kernel, tile_b=tb, tile_c=tc),
        out_shape=jax.ShapeDtypeStruct((nrb * 8, 128), jnp.float32),
        grid=(nrb, ncb),
        in_specs=[
            pl.BlockSpec((tb, tc), lambda bi, ci: (bi, ci)),   # logits tile
            pl.BlockSpec((tb, 1), lambda bi, ci: (bi, 0)),     # labels tile
        ],
        # One (8,128) partial per row block -> megacore-safe + lane-dense stores.
        out_specs=pl.BlockSpec((8, 128), lambda bi, ci: (bi, 0)),
        scratch_shapes=[pltpu.VMEM((8, 128), jnp.float32)],
        compiler_params=pltpu.CompilerParams(
            dimension_semantics=("parallel", "arbitrary"),
            vmem_limit_bytes=_VMEM_LIMIT,
        ),
    )(logits, labels_pad)

    return jnp.sum(partials, dtype=jnp.float32)


# ---------------------------------------------------------------------------
# GATHER path (scalar prefetch + data-dependent index_map)
# ---------------------------------------------------------------------------
def _gather_kernel(labels_sm, logits_ref, out_ref, *, num_rows):
    bi = pl.program_id(0)
    r = pl.program_id(1)                       # sublane within this row block
    gr = bi * 8 + r                            # global row id

    @pl.when(r == 0)
    def _init():
        out_ref[...] = jnp.zeros_like(out_ref)

    lab = labels_sm[gr]                        # SMEM scalar read
    col = lab % 128                            # lane within the fetched block
    row_io = jax.lax.broadcasted_iota(jnp.int32, (8, 128), 0)
    col_io = jax.lax.broadcasted_iota(jnp.int32, (8, 128), 1)
    hit = (row_io == r) & (col_io == col)
    hit = jnp.logical_and(hit, gr < num_rows)  # padded rows contribute nothing

    out_ref[...] += jnp.where(hit, logits_ref[...], 0).astype(jnp.float32)


def _gather_selected_sum(logits, labels, num_rows):
    Bp, Cp = logits.shape
    rows_pad = ((num_rows + 7) // 8) * 8
    nrb = rows_pad // 8
    ncb = pl.cdiv(Cp, 128)

    # Padded labels are 0 (a valid, in-range class) so the index_map never goes
    # out of bounds; their contribution is masked inside the kernel.
    labels_flat = jnp.zeros((rows_pad,), dtype=jnp.int32).at[:num_rows].set(labels)

    def logits_map(bi, r, lab):
        # Only DMA the 128-wide class block that contains this row's label.
        blk = jnp.clip(lab[bi * 8 + r] // 128, 0, ncb - 1)
        return (bi, blk)

    grid_spec = pltpu.PrefetchScalarGridSpec(
        num_scalar_prefetch=1,
        grid=(nrb, 8),
        in_specs=[pl.BlockSpec((8, 128), logits_map)],
        out_specs=pl.BlockSpec((8, 128), lambda bi, r, lab: (bi, 0)),
    )

    partials = pl.pallas_call(
        functools.partial(_gather_kernel, num_rows=num_rows),
        grid_spec=grid_spec,
        out_shape=jax.ShapeDtypeStruct((rows_pad, 128), jnp.float32),
        compiler_params=pltpu.CompilerParams(
            dimension_semantics=("parallel", "arbitrary"),
            vmem_limit_bytes=_VMEM_LIMIT,
        ),
    )(labels_flat, logits)

    return jnp.sum(partials, dtype=jnp.float32)


# ---------------------------------------------------------------------------
# Public wrapper
# ---------------------------------------------------------------------------
def my_smooth_loss(logits: jax.Array, labels: jax.Array, *,
                   row_block=None, col_block=None, path="auto") -> jax.Array:
    """logits: (B, C) float32/bfloat16, labels: (B,) int -> scalar float32 loss."""
    B, C = logits.shape
    labels = labels.astype(jnp.int32)

    # Pad tiny dims so blocks can be (>=8, >=128) while staying <= array dims.
    # (Padded values are never selected: padded rows use label -1 / validity
    #  masking, padded columns can never equal a valid label.)
    if B < 8:
        logits = jnp.pad(logits, ((0, 8 - B), (0, 0)))
    if C < 128:
        logits = jnp.pad(logits, ((0, 0), (0, 128 - C)))

    if path == "auto":
        # Streaming reads C*itemsize bytes per row; the gather path costs ~one
        # grid step (~0.35us) + a 4 KiB block per row. Gather only wins for
        # vocab-scale C (>= ~128K f32 / ~256K bf16 classes).
        itemsize = jnp.dtype(logits.dtype).itemsize
        path = "gather" if C * itemsize >= (512 * 1024) else "stream"

    if path == "gather":
        total = _gather_selected_sum(logits, labels, B)
    else:
        total = _stream_selected_sum(logits, labels, B, row_block, col_block)

    # 10 * mean(1 - selected) == 10 - (10 / B) * sum(selected)
    return 10.0 - (10.0 / B) * total


def _reference(logits, labels):
    b = logits.shape[0]
    sel = logits.astype(jnp.float32)[jnp.arange(b), labels]
    return 10.0 * jnp.mean(1.0 - sel)


if __name__ == "__main__":
    key = jax.random.PRNGKey(0)
    ks = jax.random.split(key, 8)

    # 1) f32, forced small tiles -> multi-block grid in both axes; exercises the
    #    cross-class-block accumulation and per-row-block parallel partials.
    B, C = 16, 512
    lg1 = jax.random.normal(ks[0], (B, C), dtype=jnp.float32)
    lb1 = jax.random.randint(ks[1], (B,), 0, C, dtype=jnp.int32)
    r1 = my_smooth_loss(lg1, lb1, row_block=8, col_block=128, path="stream")
    jax.block_until_ready(r1)
    assert jnp.allclose(r1, _reference(lg1, lb1), atol=1e-5, rtol=1e-5), (r1, _reference(lg1, lb1))

    # 2) bf16 logits, ragged row and class blocks, default tiles.
    B, C = 12, 160
    lg2 = jax.random.normal(ks[2], (B, C), dtype=jnp.float32).astype(jnp.bfloat16)
    lb2 = jax.random.randint(ks[3], (B,), 0, C, dtype=jnp.int32)
    r2 = my_smooth_loss(lg2, lb2, path="stream")
    jax.block_until_ready(r2)
    assert jnp.allclose(r2, _reference(lg2, lb2), atol=1e-4, rtol=1e-4), (r2, _reference(lg2, lb2))

    # 3) tiny batch (< 8 rows) with C < 128 -> exercises the padding path (auto -> stream).
    B, C = 5, 100
    lg3 = jax.random.normal(ks[4], (B, C), dtype=jnp.float32)
    lb3 = jax.random.randint(ks[5], (B,), 0, C, dtype=jnp.int32)
    r3 = my_smooth_loss(lg3, lb3)
    jax.block_until_ready(r3)
    assert jnp.allclose(r3, _reference(lg3, lb3), atol=1e-5, rtol=1e-5), (r3, _reference(lg3, lb3))

    # 4) scalar-prefetch gather path (large-vocab fast path), forced at a small shape.
    B, C = 16, 384
    lg4 = jax.random.normal(ks[6], (B, C), dtype=jnp.float32)
    lb4 = jax.random.randint(ks[7], (B,), 0, C, dtype=jnp.int32)
    r4 = my_smooth_loss(lg4, lb4, path="gather")
    jax.block_until_ready(r4)
    assert jnp.allclose(r4, _reference(lg4, lb4), atol=1e-5, rtol=1e-5), (r4, _reference(lg4, lb4))

    print("KERNEL_OK")
</pallas_src>

<mosaic_0001>
module attributes {stable_mosaic.version = 11 : i64} {
  func.func @_stream_kernel(%arg0: i32, %arg1: i32, %arg2: memref<8x128xf32, #tpu.memory_space<vmem>>, %arg3: memref<8x1xi32, #tpu.memory_space<vmem>>, %arg4: memref<8x128xf32, #tpu.memory_space<vmem>>, %arg5: memref<8x128xf32, #tpu.memory_space<vmem>>) attributes {dimension_semantics = [#tpu.dimension_semantics<parallel>, #tpu.dimension_semantics<arbitrary>], iteration_bounds = array<i64: 2, 4>, scalar_prefetch = 0 : i64, scratch_operands = 1 : i64, tpu.core_type = #tpu.core_type<tc>, window_params = [{transform_indices = @transform_0, window_bounds = array<i64: 8, 128>}, {transform_indices = @transform_1, window_bounds = array<i64: 8, 1>}, {transform_indices = @transform_2, window_bounds = array<i64: 8, 128>}]} {
    %c0_i32 = arith.constant 0 : i32
    %0 = arith.cmpi eq, %arg1, %c0_i32 : i32
    %1 = arith.extui %0 : i1 to i32
    %c0_i32_0 = arith.constant 0 : i32
    %2 = arith.cmpi ne, %1, %c0_i32_0 : i32
    scf.if %2 {
      %cst = arith.constant 0.000000e+00 : f32
      %21 = vector.broadcast %cst : f32 to vector<8x128xf32>
      %c0_10 = arith.constant 0 : index
      %c0_11 = arith.constant 0 : index
      %22 = vector.load %arg5[%c0_10, %c0_11] : memref<8x128xf32, #tpu.memory_space<vmem>>, vector<8x128xf32>
      tpu.vector_store %arg5[%c0_10, %c0_11], %21 {strides = array<i32>} : memref<8x128xf32, #tpu.memory_space<vmem>>, vector<8x128xf32>,
    } else {
    }
    %c0 = arith.constant 0 : index
    %c0_1 = arith.constant 0 : index
    %3 = vector.load %arg3[%c0, %c0_1] : memref<8x1xi32, #tpu.memory_space<vmem>>, vector<8x1xi32>
    %c128_i32 = arith.constant 128 : i32
    %4 = arith.muli %arg1, %c128_i32 : i32
    %5 = vector.broadcast %4 : i32 to vector<8x1xi32>
    %6 = arith.subi %3, %5 : vector<8x1xi32>
    %7 = tpu.iota {dimensions = array<i32: 1>} : vector<1x128xi32>
    %8 = vector.broadcast %7 : vector<1x128xi32> to vector<8x128xi32>
    %9 = vector.broadcast %6 : vector<8x1xi32> to vector<8x128xi32>
    %10 = arith.cmpi eq, %8, %9 : vector<8x128xi32>
    %c0_2 = arith.constant 0 : index
    %c0_3 = arith.constant 0 : index
    %11 = vector.load %arg2[%c0_2, %c0_3] : memref<8x128xf32, #tpu.memory_space<vmem>>, vector<8x128xf32>
    %c0_i32_4 = arith.constant 0 : i32
    %12 = arith.sitofp %c0_i32_4 : i32 to f32
    %13 = vector.broadcast %12 : f32 to vector<8x128xf32>
    %14 = arith.select %10, %11, %13 : vector<8x128xi1>, vector<8x128xf32>
    %c0_5 = arith.constant 0 : index
    %c0_6 = arith.constant 0 : index
    %15 = vector.load %arg5[%c0_5, %c0_6] : memref<8x128xf32, #tpu.memory_space<vmem>>, vector<8x128xf32>
    %16 = arith.addf %15, %14 : vector<8x128xf32>
    %c0_7 = arith.constant 0 : index
    %c0_8 = arith.constant 0 : index
    %17 = vector.load %arg5[%c0_7, %c0_8] : memref<8x128xf32, #tpu.memory_space<vmem>>, vector<8x128xf32>
    tpu.vector_store %arg5[%c0_7, %c0_8], %16 {strides = array<i32>} : memref<8x128xf32, #tpu.memory_space<vmem>>, vector<8x128xf32>,
    %c3_i32 = arith.constant 3 : i32
    %18 = arith.cmpi eq, %arg1, %c3_i32 : i32
    %19 = arith.extui %18 : i1 to i32
    %c0_i32_9 = arith.constant 0 : i32
    %20 = arith.cmpi ne, %19, %c0_i32_9 : i32
    scf.if %20 {
      %c0_10 = arith.constant 0 : index
      %c0_11 = arith.constant 0 : index
      %21 = vector.load %arg5[%c0_10, %c0_11] : memref<8x128xf32, #tpu.memory_space<vmem>>, vector<8x128xf32>
      %c0_12 = arith.constant 0 : index
      %c0_13 = arith.constant 0 : index
      %22 = vector.load %arg4[%c0_12, %c0_13] : memref<8x128xf32, #tpu.memory_space<vmem>>, vector<8x128xf32>
      tpu.vector_store %arg4[%c0_12, %c0_13], %21 {strides = array<i32>} : memref<8x128xf32, #tpu.memory_space<vmem>>, vector<8x128xf32>,
    } else {
    }
    return
  }
  func.func @transform_0(%arg0: i32, %arg1: i32) -> (i32, i32) {
    %c0_i32 = arith.constant 0 : i32
    return %arg0, %arg1 : i32, i32
  }
  func.func @transform_1(%arg0: i32, %arg1: i32) -> (i32, i32) {
    %c0_i32 = arith.constant 0 : i32
    %c0_i32_0 = arith.constant 0 : i32
    return %arg0, %c0_i32 : i32, i32
  }
  func.func @transform_2(%arg0: i32, %arg1: i32) -> (i32, i32) {
    %c0_i32 = arith.constant 0 : i32
    %c0_i32_0 = arith.constant 0 : i32
    return %arg0, %c0_i32 : i32, i32
  }
}

</mosaic_0001>

<bundles_post_ra>
// kernel: tpu_custom_call.1
= control target key start
LH: loop header
LB: loop body
LE: loop exit
PB: predicated region body
PF: predicated region fallthrough
CT: control target
= control target key end

     0   :  { %7 = vsyncpa [#allocation4], 0  ;;  %s854_s0 = inlined_call_operand.hbm [shape: f32[16,512], index: 0, kind: input, shape index: {}]   ;;  %s855_s1 = inlined_call_operand.vmem [shape: s32[16,1], index: 1, kind: input, shape index: {}]   ;;  %s856_s2 = inlined_call_operand.hbm [shape: f32[16,128], index: 2, kind: output, shape index: {}]  }
   0x1   :  { %9 = vsyncpa [#allocation4 + $0x1], 0 }
   0x2   :  { %10 = vsyncpa [#allocation5], 0 }
   0x3   :  { %12 = vsyncpa [#allocation5 + $0x1], 0  ;;  %s623_s9 = smov 0   ;;  %s625_s10 = smov 0  }
   0x4   :  { %s627_s11 = smov 0   ;;  %s629_s12 = smov 0  }
   0x5   :  { %s631_s13 = smov 0   ;;  %s633_s14 = smov 0  }
   0x6   :  { %s635_s15 = smov 0   ;;  %s637_s16 = smov 0  }
   0x7   :  { %s639_s17 = smov 0   ;;  %s641_s18 = smov 0  }
   0x8   :  { %s643_s19 = smov 0  }
   0x9 LB: > { %s327_s20 = sadd.s32 4294967295, %s602_s19   ;;  %s328_s21 = sadd.s32 4294967294, %s602_s19   ;;  %s602_s19 = sphi %s643_s19, %s18_s19   ;;  %s598_s18 = sphi %s641_s18, %s879_s18   ;;  %s594_s17 = sphi %s639_s17, %s878_s17   ;;  %s590_s16 = sphi %s637_s16, %s877_s16   ;;  %s586_s15 = sphi %s635_s15, %s876_s15   ;;  %s582_s14 = sphi %s633_s14, %s875_s14   ;;  %s578_s13 = sphi %s631_s13, %s874_s13   ;;  %s574_s12 = sphi %s629_s12, %s873_s12   ;;  %s570_s11 = sphi %s627_s11, %s872_s11   ;;  %s566_s10 = sphi %s625_s10, %s871_s10   ;;  %s562_s9 = sphi %s623_s9, %s870_s9  }
   0xa   : > { %s27_s22 = sadd.s32 1, %s594_s17  ;;  %s30_s23 = sadd.s32 1, %s598_s18 }
   0xb   : > { %p28_p0 = scmp.ge.s32.totalorder %s27_s22, 4  ;;  %s39_s24 = sadd.s32 1, %s582_s14 }
   0xc   : > { %p46_p1 = scmp.ne.s32.totalorder %s582_s14, %s578_s13  ;;  %p47_p2 = scmp.eq.s32.totalorder %s602_s19, 0 }
   0xd   : > { %s881_s22 = smov (%p28_p0, %s27_s22), 0  ;;  %s883_s23 = smov (!%p28_p0, %s30_s23), %s598_s18 }
   0xe   : > { %s35_s25 = ssub.s32 %s594_s17, %s881_s22  ;;  %p689_p3 = por %p47_p2, %p46_p1 }
   0xf   : > { %p32_p4 = scmp.ge.s32.totalorder %s883_s23, 2  ;;  %p52_p5 = scmp.ne.s32.totalorder %s578_s13, %s574_s12 }
  0x10   : > { %p53_p6 = scmp.eq.s32.totalorder %s327_s20, 0  ;;  %s91_s27 = sadd.s32 1, %s570_s11 }
  0x11   : > { %s885_s23 = smov (%p32_p4, %s883_s23), 0  ;;  %p101_p8 = scmp.ne.s32.totalorder %s570_s11, %s566_s10 }
  0x12   : > { %860 = sst [smem:[#allocation9_spill]] %s885_s23  ;;  %p697_p7 = por %p53_p6, %p52_p5 }
  0x13   : > { %s34_s29 = ssub.s32 %s598_s18, %s885_s23  ;;  %p102_p9 = scmp.eq.s32.totalorder %s327_s20, 7 }
  0x14   : > { %s36_s30 = sor.u32 %s35_s25, %s34_s29  ;;  %p89_p10 = scmp.eq.s32.totalorder %s34_s29, 0 }
  0x15   : > { %p37_p11 = scmp.eq.s32.totalorder %s36_s30, 0  ;;  %p705_p12 = por %p102_p9, %p101_p8 }
  0x16   : > { %s710_s4 = scalar_select %p89_p10, %s570_s11, %s91_s27  }
  0x17   : > { %s862_s3 = scalar_select %p705_p12, 1, 0 }
  0x18   : > { %s713_s5 = scalar_select %p37_p11, %s582_s14, %s39_s24  }
  0x19   : > { %p107_p13 = scmp.ne.s32.totalorder %s566_s10, %s562_s9  ;;  %p108_p0 = scmp.eq.s32.totalorder %s328_s21, 7 }
  0x1a   : > { %p357_p1 = scmp.lt.s32.totalorder %s602_s19, 8  ;;  %s128_s7 = sand.u32 1, %s582_s14  }
  0x1b   : > { %p718_p2 = por %p108_p0, %p107_p13  ;;  %s331_s8 = sshll.u32 %s128_s7, 3 }
  0x1c   : > { %s332_s12 = sshll.u32 %s598_s18, 2  ;;  %s132_s25 = scalar_lea.vmem [#allocation3], %s331_s8 }
  0x1d   : > { %s863_s6 = scalar_select %p718_p2, 1, 0 }
  0x1e   : > { %s137_s20 = sadd.s32 %s594_s17, %s332_s12  ;;  %s141_s29 = sshll.u32 %s132_s25, 4  ;;  %s725_s29 = int_to_ptr.vmem [resolvable:$true] %s141_s29 }
  0x1f   : > { %s333_s30 = sshll.u32 %s137_s20, 7  ;;  %p734_p4 = pnand %p357_p1, %p689_p3 }
  0x20   : > { %s730_s23 = scalar_lea.hbm %s854_s0, %s333_s30  ;;  %s129_s8 = scalar_lea.sflag [#allocation4], %s128_s7 }
  0x21   : > { %s450_s12 = scalar_lea.hbm %s730_s23, 128  ;;  %p452_p9 = pneg %p734_p4 }
  0x22   : > { %p451_p8 = scmp.ne.s32.totalorder %s730_s23, %s450_s12  ;;  %s455_s25 = scalar_lea.hbm %s854_s0, 1024 }
  0x23   : > { %p456_p3 = scmp.lt.u32.totalorder %s730_s23, %s854_s0  ;;  %p457_p13 = scmp.lt.u32.totalorder %s455_s25, %s450_s12 }
  0x24   : > { %p453_p10 = pnand %p452_p9, %p451_p8  ;;  %p459_p1 = scmp.lt.u32.totalorder %s450_s12, %s730_s23 }
  0x25   : > { %p458_p0 = por %p457_p13, %p456_p3 }
  0x26   : > { %p454_p11 = pneg %p453_p10 }
  0x27   : > { %p460_p5 = por %p459_p1, %p458_p0 }
  0x29   : > { %p461_p6 = pnand %p460_p5, %p454_p11 }
  0x2b   : > { %464 = shalt.err (!%p461_p6)
}
  0x2c   : > { %s465_s7 = scalar_lea.vmem %s725_s29, 128  ;;  %s604_s24 = smov [#allocation3]  }
  0x2d   : > { %p466_p8 = scmp.ne.s32.totalorder %s725_s29, %s465_s7  ;;  %s470_s26 = sshll.u32 %s604_s24, 4  ;;  %s471_s26 = int_to_ptr.vmem [resolvable:$false] %s470_s26 }
  0x2e   : > { %s472_s20 = scalar_lea.vmem %s471_s26, 256  ;;  %p473_p12 = scmp.lt.s32.totalorder %s725_s29, %s471_s26 }
  0x2f   : > { %p468_p10 = pnand %p466_p8, %p452_p9  ;;  %p474_p3 = scmp.lt.s32.totalorder %s472_s20, %s465_s7 }
  0x31   : > { %p469_p2 = pneg %p468_p10  ;;  %p475_p13 = por %p474_p3, %p473_p12 }
  0x33   : > { %p476_p0 = pnand %p475_p13, %p469_p2 }
  0x35   : > { %479 = shalt.err (!%p476_p0)
}
  0x36   : > { %352 = dma.hbm_to_vmem [thread:$0]  (!%p734_p4), %s730_s23, 128, %s725_s29, %s129_s8  }
  0x37   : > { %p865_p5 = scmp.lt.s32.totalorder %s602_s19, 9  ;;  %p866_p6 = scmp.ge.s32.totalorder %s602_s19, 1 }
  0x39   : > { %p154_p9 = pnand %p866_p6, %p865_p5 }
  0x3a   : > { %s159_s12 = sand.u32 (!%p154_p9), 1, %s578_s13  }
  0x3b   : > { %157 = sbr.rel (%p154_p9) target bundleno = 247 (0xf7), region = 28  ;;  %s335_s25 = sshll.u32 (!%p154_p9), %s159_s12, 3 }
  0x3c   : > { %s160_s30 = scalar_lea.sflag (!%p154_p9), [#allocation4], %s159_s12  ;;  %s163_s27 = scalar_lea.vmem (!%p154_p9), [#allocation3], %s335_s25 }
  0x42   : > { %553 = dma.done.wait (%p697_p7), %s160_s30, 128  }
  0x43   : > { %555 = vsyncadd (%p697_p7), %s160_s30, 4294967168  ;;  %s185_s23 = sand.u32 1, %s566_s10   ;;  %p188_p12 = scmp.lt.s32.totalorder %s590_s16, 1 }
  0x44   : > { %s778_s29 = sshll.u32 %s185_s23, 3  ;;  %p338_p2 = scmp.ne.s32.totalorder %s586_s15, 0 }
  0x45   : > { %s189_s21 = scalar_select %p188_p12, %s590_s16, 1 }
  0x46   : > { %s187_s20 = scalar_lea.vmem [#allocation6], %s778_s29  ;;  %195 = sbr.rel (%p338_p2) target bundleno = 77 (0x4d), region = 36  ;;  %v605_v0 = vmov (!%p338_p2), 0.0  }
  0x47   : > { %s337_s8 = sshll.u32 %s189_s21, 3  ;;  %196 = vst [vmem:[#allocation2] sm:$0xff] (!%p338_p2), %v605_v0 }
  0x48   : > { %s191_s26 = scalar_lea.vmem %s855_s1, %s337_s8 }
  0x4d PF: > { %v197_v1 = vld [vmem:[%s191_s26] sm:$0xff]  ;;  %s339_s28 = sshll.u32 %s586_s15, 7  ;;  %v606_v2 = vmov 0   ;;  %v201_v5 = vlaneseq  ;;  %v207_v7 = vld [vmem:[%s163_s27] sm:$0xff]  ;;  %p340_p7 = scmp.ne.s32.totalorder %s586_s15, 3 }
  0x4e   : > { %449 = vset.pattern.permute.xlu0 %v606_v2  ;;  %v199_v3 = vstv %s339_s28  ;;  %v209_v8 = vld [vmem:[#allocation2] sm:$0xff] }
  0x4f   : > { %v200_v4 = vsub.s32 %v197_v1, %v199_v3  ;;  %v202_v6 = vand.u32 127, %v201_v5 }
  0x51   : > { %204 = vperm.xlu0 %449, %v200_v4  }
  0xcf   : > { %215 = sbr.rel (%p340_p7) target bundleno = 222 (0xde), region = 40 }
  0xd0   : > { %v205_v9 = vpop.permute.xlu0 %204 }
  0xd1   : > { %vm206_vm0 = vcmp.eq.s32.totalorder %v202_v6, %v205_v9 }
  0xd2   : > { %v208_v10 = vsel %vm206_vm0, %v207_v7, 0.0 }
  0xd3   : > { %v210_v11 = vadd.f32 %v209_v8, %v208_v10 }
  0xd5   : > { %211 = vst [vmem:[#allocation2] sm:$0xff] %v210_v11 }
  0xdc   : > { %v216_v12 = vld [vmem:[#allocation2] sm:$0xff] }
  0xdd   : > { %217 = vst [vmem:[%s187_s20] sm:$0xff] %v216_v12 }
  0xde PF: > { %s342_s12 = sshll.u32 %s590_s16, 7  ;;  %s232_s21 = sshll.u32 %s187_s20, 4  ;;  %s233_s21 = int_to_ptr.vmem [resolvable:$true] %s232_s21 }
  0xdf   : > { %s794_s27 = scalar_lea.hbm %s856_s2, %s342_s12  ;;  %s219_s15 = scalar_lea.sflag [#allocation5], %s185_s23 }
  0xe0   : > { %s480_s8 = scalar_lea.vmem %s233_s21, 128  ;;  %p867_p11 = scmp.ne.s32.totalorder %s862_s3, 0 }
  0xe1   : > { %p481_p4 = scmp.ne.s32.totalorder %s233_s21, %s480_s8  ;;  %s607_s7 = smov [#allocation6]  }
  0xe2   : > { %s484_s24 = sshll.u32 %s607_s7, 4  ;;  %s485_s24 = int_to_ptr.vmem [resolvable:$false] %s484_s24 }
  0xe3   : > { %p482_p1 = pnand %p481_p4, %p867_p11  ;;  %s486_s26 = scalar_lea.vmem %s485_s24, 256 }
  0xe4   : > { %p487_p10 = scmp.lt.s32.totalorder %s233_s21, %s485_s24  ;;  %p488_p3 = scmp.lt.s32.totalorder %s486_s26, %s480_s8 }
  0xe5   : > { %p483_p8 = pneg %p482_p1 }
  0xe6   : > { %p489_p13 = por %p488_p3, %p487_p10 }
  0xe8   : > { %p490_p0 = pnand %p489_p13, %p483_p8 }
  0xea   : > { %493 = shalt.err (!%p490_p0)
}
  0xeb   : > { %s494_s16 = scalar_lea.hbm %s794_s27, 128  ;;  %s498_s20 = scalar_lea.hbm %s856_s2, 256 }
  0xec   : > { %p495_p5 = scmp.ne.s32.totalorder %s794_s27, %s494_s16  ;;  %p499_p12 = scmp.lt.u32.totalorder %s794_s27, %s856_s2 }
  0xed   : > { %p500_p2 = scmp.lt.u32.totalorder %s498_s20, %s494_s16  ;;  %p502_p4 = scmp.lt.u32.totalorder %s494_s16, %s794_s27 }
  0xee   : > { %p496_p6 = pnand %p495_p5, %p867_p11 }
  0xef   : > { %p501_p7 = por %p500_p2, %p499_p12 }
  0xf0   : > { %p497_p9 = pneg %p496_p6 }
  0xf1   : > { %p503_p1 = por %p502_p4, %p501_p7 }
  0xf3   : > { %p504_p8 = pnand %p503_p1, %p497_p9 }
  0xf5   : > { %507 = shalt.err (!%p504_p8)
}
  0xf6   : > { %347 = dma.vmem_to_hbm [thread:$0]  (%p867_p11), %s233_s21, 128, %s794_s27, %s219_s15  }
  0xf7 PF: > { %p358_p10 = scmp.ge.s32.totalorder %s602_s19, 2  ;;  %s244_s25 = sand.u32 1, %s562_s9  }
  0xf8   : > { %p868_p3 = scmp.ne.s32.totalorder %s863_s6, 0  ;;  %s245_s30 = scalar_lea.sflag [#allocation5], %s244_s25 }
  0xfa   : > { %p354_p13 = pnand %p358_p10, %p868_p3 }
  0xfc   : > { %557 = dma.done.wait (!%p354_p13), %s245_s30, 128  }
  0xfd   : > { %559 = vsyncadd (!%p354_p13), %s245_s30, 4294967168  ;;  %s18_s19 = sadd.s32 1, %s602_s19   ;;  %s869_s3 = sld [smem:[#allocation9_spill]] }
  0xfe   : > { %p15_p0 = scmp.ge.s32.totalorder %s18_s19, 10   ;;  %s870_s9 = smov %s566_s10 }
  0xff   : > { %s871_s10 = smov %s570_s11  ;;  %s872_s11 = smov %s710_s4 }
 0x100   : > { %s873_s12 = smov %s578_s13  ;;  %s874_s13 = smov %s582_s14 }
 0x101   : > { %s875_s14 = smov %s713_s5  ;;  %s876_s15 = smov %s594_s17 }
 0x102   : > { %s877_s16 = smov %s598_s18  ;;  %s878_s17 = smov %s881_s22 }
 0x103   : > { %s879_s18 = smov %s869_s3  ;;  %17 = sbr.rel (!%p15_p0) target bundleno = 9 (0x9), region = 84 }
 0x10a   :  { %250 = vsyncpa [#allocation4], 1 }
 0x10b   :  { %252 = vsyncpa [#allocation4 + $0x1], 1 }
 0x10c   :  { %253 = vsyncpa [#allocation5], 1 }
 0x10d   :  { %255 = vsyncpa [#allocation5 + $0x1], 1 }

</bundles_post_ra>
